<compile_context>
chip_gen: v6e
topology: v6e:2x2x1
jax: 0.10.0
libtpu: 0.0.40
codegen_flags: <defaults>
</compile_context>

<pallas_src>
import functools

import jax
import jax.numpy as jnp
import numpy as np
from jax.experimental import pallas as pl
from jax.experimental.pallas import tpu as pltpu


def _round_up(x, m):
    return -(-x // m) * m


def _mask_latent_kernel(idx_ref, z_ref, z_out_ref, *maybe_mask_ref, groups):
    """idx_ref: (Bt, 1, T) int; z_ref: (Bt, n_in, T); z_out_ref: (Bt, n_out, T);
    optional mask ref: (Bt, C, T) int8/bool (1/True => zeroed).

    The gathered mask row masks[idx][c] is exactly (c >= groups*(idx+1)), so the
    per-pixel gather from the mask table is a VPU iota compare, not a VMEM gather.
    """
    n_out = z_out_ref.shape[1]
    keep_upto = groups * (idx_ref[...].astype(jnp.int32) + 1)     # (Bt, 1, T)

    if maybe_mask_ref:
        mask_ref = maybe_mask_ref[0]
        Bt, C, T = mask_ref.shape
        chan = jax.lax.broadcasted_iota(jnp.int32, (Bt, C, T), 1)  # channel id / element
        masked = chan >= keep_upto                                 # True => zero
        mask_ref[...] = masked.astype(mask_ref.dtype)
        keep = jnp.logical_not(masked[:, :n_out, :])               # reuse same predicate
    else:
        Bt, _, T = z_out_ref.shape
        chan = jax.lax.broadcasted_iota(jnp.int32, (Bt, n_out, T), 1)
        keep = chan < keep_upto

    # Only the first n_out channels of z are needed; z_ref is either already the
    # aligned cropped view (n_in == n_out) or a sublane-rounded prefix of it.
    z = z_ref[...] if z_ref.shape[1] == n_out else z_ref[:, :n_out, :]
    z_out_ref[...] = jnp.where(keep, z, 0).astype(z_out_ref.dtype)


def _device_defaults():
    """Per-generation block-size target and min grid steps (2 TCs on v7x)."""
    try:
        kind = jax.devices()[0].device_kind.lower()
    except Exception:
        kind = ""
    if "v5e" in kind or "v5 lite" in kind or "v5litepod" in kind:
        target = 4 * 1024 * 1024          # ~0.8 TB/s: 4 MiB keeps step overhead <10%
    elif "v6" in kind:
        target = 6 * 1024 * 1024          # ~1.4 TB/s
    else:
        target = 8 * 1024 * 1024          # v7x / unknown: highest HBM BW
    min_steps = 2 if "7" in kind else 1   # feed both v7x TensorCores
    return target, min_steps


def _choose_tiles(B, HW, bytes_per_hw, target_bytes, min_steps):
    """Pick (batch_tile, hw_tile). Each grid step moves ~target_bytes; hw tiles are
    multiples of 128 (cdiv grid, masked boundary block) or the full extent."""
    per_row = bytes_per_hw * HW
    if per_row >= target_bytes:
        bt = 1
        thw = max(128, (target_bytes // bytes_per_hw) // 128 * 128)
        thw = min(thw, _round_up(HW, 128))
    else:
        thw = HW                                   # full extent (legal for any HW)
        bt = min(B, max(1, target_bytes // per_row))

    def cells(bt_, thw_):
        return pl.cdiv(B, bt_) * pl.cdiv(HW, thw_)

    while cells(bt, thw) < min_steps:              # only v7x asks for >= 2 steps
        if bt > 1:
            bt = (bt + 1) // 2
        elif thw > 128:
            thw = max(128, _round_up(thw // 2, 128))
        else:
            break
    return bt, thw


def mask_latent_forward(z, idx, *, groups, n=None, return_mask=True, bool_mask=False,
                        donate_z=False, target_block_bytes=None):
    """z: (B, C, H, W); idx: (B, H, W) integer array in [0, C // groups).

    Returns (z_masked [cropped to n channels if n is given], mask) where mask is
    (B, C, H, W), 1/True => zeroed (int8 by default, bool when bool_mask=True),
    or (z_masked, None) when return_mask=False.
    """
    B, C, H, W = z.shape
    assert C % groups == 0
    assert jnp.issubdtype(idx.dtype, jnp.integer)
    if n is None:
        n_out = C
    else:
        assert 0 < n <= C and n % groups == 0
        n_out = n
    HW = H * W

    default_target, min_steps = _device_defaults()
    if target_block_bytes is None:
        target_block_bytes = default_target

    z_flat = z.reshape(B, C, HW)
    idx_flat = idx.reshape(B, 1, HW)               # native dtype, widened in-kernel

    # Channels of z actually DMA'd per block: sublane-aligned prefix covering n_out.
    z_item = jnp.dtype(z.dtype).itemsize
    sublane = max(8, 32 // z_item)
    n_in = C if n_out == C else min(C, _round_up(n_out, sublane))

    mask_dtype = jnp.bool_ if bool_mask else jnp.int8
    idx_item = jnp.dtype(idx.dtype).itemsize
    bytes_per_hw = (n_in + n_out) * z_item + idx_item + (C if return_mask else 0)
    Bt, THW = _choose_tiles(B, HW, bytes_per_hw, target_block_bytes, min_steps)
    grid = (pl.cdiv(B, Bt), pl.cdiv(HW, THW))

    step_bytes = Bt * THW * bytes_per_hw
    vmem_limit = int(min(64 * 1024 * 1024, max(32 * 1024 * 1024, 3 * step_bytes)))

    kernel = functools.partial(_mask_latent_kernel, groups=groups)

    in_specs = [
        pl.BlockSpec((Bt, 1, THW), lambda b, s: (b, 0, s)),
        pl.BlockSpec((Bt, n_in, THW), lambda b, s: (b, 0, s)),
    ]
    z_out_spec = pl.BlockSpec((Bt, n_out, THW), lambda b, s: (b, 0, s))
    if return_mask:
        out_shape = (jax.ShapeDtypeStruct((B, n_out, HW), z.dtype),
                     jax.ShapeDtypeStruct((B, C, HW), mask_dtype))
        out_specs = [z_out_spec, pl.BlockSpec((Bt, C, THW), lambda b, s: (b, 0, s))]
    else:
        out_shape = jax.ShapeDtypeStruct((B, n_out, HW), z.dtype)
        out_specs = z_out_spec

    io_aliases = {}
    if donate_z and n_in == C and n_out == C:
        # In-place masked_fill: z_out reuses z's HBM buffer (z in/out specs identical).
        io_aliases = {1: 0}

    result = pl.pallas_call(
        kernel,
        out_shape=out_shape,
        grid_spec=pltpu.PrefetchScalarGridSpec(
            num_scalar_prefetch=0,
            grid=grid,
            in_specs=in_specs,
            out_specs=out_specs,
        ),
        compiler_params=pltpu.CompilerParams(
            dimension_semantics=("parallel", "parallel"),
            vmem_limit_bytes=vmem_limit),
        input_output_aliases=io_aliases,
    )(idx_flat, z_flat)

    if return_mask:
        z_out, mask = result
        return z_out.reshape(B, n_out, H, W), mask.reshape(B, C, H, W)
    return result.reshape(B, n_out, H, W), None


def _reference_masks_table(features, groups):
    """Numpy replica of the PyTorch buffer construction in __init__."""
    masks = ~(np.cumsum(np.eye(features), axis=0).astype(bool))
    select = masks.sum(1) % groups == 0
    return masks[select]


# TODO(synk): torch.randint RNG for idx is generated with jax.random in the wrapper/demo
# rather than inside the kernel (pltpu.prng_* could be used if in-kernel sampling is needed).

if __name__ == "__main__":
    features, groups = 32, 4
    B, H, W = 2, 16, 16
    num_masks = features // groups   # rows surviving the `select` filter

    key = jax.random.PRNGKey(0)
    kz, ki = jax.random.split(key)
    z = jax.random.normal(kz, (B, features, H, W), dtype=jnp.float32)
    idx = jax.random.randint(ki, (B, H, W), 0, num_masks, dtype=jnp.int32)

    # Reference: literal masks-table gather + masked_fill, as in the PyTorch module.
    masks_np = _reference_masks_table(features, groups)
    idx_np = np.asarray(idx)
    mask_ref = np.transpose(masks_np[idx_np], (0, 3, 1, 2))   # b h w c -> b c h w
    z_ref = np.where(mask_ref, 0.0, np.asarray(z))

    # 1) default path: masked z + full-C int8 mask
    z_out, mask = mask_latent_forward(z, idx, groups=groups)
    jax.block_until_ready((z_out, mask))
    assert np.array_equal(np.asarray(mask).astype(bool), mask_ref), "mask mismatch"
    assert np.allclose(np.asarray(z_out), z_ref), "masked z mismatch"

    # 2) crop path (n given): only an aligned channel prefix of z is read/written
    z_crop, mask_crop = mask_latent_forward(z, idx, groups=groups, n=8)
    jax.block_until_ready((z_crop, mask_crop))
    assert z_crop.shape == (B, 8, H, W)
    assert np.allclose(np.asarray(z_crop), z_ref[:, :8]), "cropped z mismatch"
    assert np.array_equal(np.asarray(mask_crop).astype(bool), mask_ref), "crop mask mismatch"

    # 3) mask-free fast path (drops the whole mask output stream)
    z_only, none_mask = mask_latent_forward(z, idx, groups=groups, return_mask=False)
    jax.block_until_ready(z_only)
    assert none_mask is None
    assert np.allclose(np.asarray(z_only), z_ref), "mask-free z mismatch"

    # 4) bf16 latents + narrow int8 idx + crop (sublane-rounded prefix read: 16 of 32 ch)
    z_bf16 = z.astype(jnp.bfloat16)
    idx_i8 = idx.astype(jnp.int8)
    zb_out, mb = mask_latent_forward(z_bf16, idx_i8, groups=groups, n=8)
    jax.block_until_ready((zb_out, mb))
    ref_bf16 = np.where(mask_ref[:, :8], 0.0, np.asarray(z_bf16.astype(jnp.float32))[:, :8])
    assert np.array_equal(np.asarray(zb_out.astype(jnp.float32)), ref_bf16), "bf16 z mismatch"
    assert np.array_equal(np.asarray(mb).astype(bool), mask_ref), "bf16-path mask mismatch"

    # 5) non-128-multiple H*W with a tiny block budget -> cdiv grid + masked boundary block
    H2 = W2 = 18
    kz2, ki2 = jax.random.split(kz)
    z2 = jax.random.normal(kz2, (B, features, H2, W2), dtype=jnp.float32)
    idx2 = jax.random.randint(ki2, (B, H2, W2), 0, num_masks, dtype=jnp.int32)
    z2_out, mask2 = mask_latent_forward(z2, idx2, groups=groups,
                                        target_block_bytes=16 * 1024)
    jax.block_until_ready((z2_out, mask2))
    mask2_ref = np.transpose(masks_np[np.asarray(idx2)], (0, 3, 1, 2))
    assert np.array_equal(np.asarray(mask2).astype(bool), mask2_ref), "boundary mask mismatch"
    assert np.allclose(np.asarray(z2_out), np.where(mask2_ref, 0.0, np.asarray(z2))), \
        "boundary z mismatch"

    print("KERNEL_OK")
</pallas_src>

<mosaic_0001>
module attributes {stable_mosaic.version = 11 : i64} {
  func.func @_mask_latent_kernel(%arg0: i32, %arg1: i32, %arg2: memref<2x1x256xi32, #tpu.memory_space<vmem>>, %arg3: memref<2x32x256xf32, #tpu.memory_space<vmem>>, %arg4: memref<2x32x256xf32, #tpu.memory_space<vmem>>, %arg5: memref<2x32x256xi8, #tpu.memory_space<vmem>>) attributes {dimension_semantics = [#tpu.dimension_semantics<parallel>, #tpu.dimension_semantics<parallel>], iteration_bounds = array<i64: 1, 1>, scalar_prefetch = 0 : i64, scratch_operands = 0 : i64, tpu.core_type = #tpu.core_type<tc>, window_params = [{transform_indices = @transform_0, window_bounds = array<i64: 2, 1, 256>}, {transform_indices = @transform_1, window_bounds = array<i64: 2, 32, 256>}, {transform_indices = @transform_2, window_bounds = array<i64: 2, 32, 256>}, {transform_indices = @transform_3, window_bounds = array<i64: 2, 32, 256>}]} {
    %c0 = arith.constant 0 : index
    %c0_0 = arith.constant 0 : index
    %c0_1 = arith.constant 0 : index
    %0 = vector.load %arg2[%c0, %c0_0, %c0_1] : memref<2x1x256xi32, #tpu.memory_space<vmem>>, vector<2x1x256xi32>
    %c1_i32 = arith.constant 1 : i32
    %1 = vector.broadcast %c1_i32 : i32 to vector<2x1x256xi32>
    %2 = arith.addi %0, %1 : vector<2x1x256xi32>
    %c4_i32 = arith.constant 4 : i32
    %3 = vector.broadcast %c4_i32 : i32 to vector<2x1x256xi32>
    %4 = arith.muli %3, %2 : vector<2x1x256xi32>
    %5 = tpu.iota {dimensions = array<i32: 1>} : vector<2x32x256xi32>
    %6 = vector.broadcast %4 : vector<2x1x256xi32> to vector<2x32x256xi32>
    %7 = arith.cmpi sge, %5, %6 : vector<2x32x256xi32>
    %8 = arith.extui %7 : vector<2x32x256xi1> to vector<2x32x256xi8>
    %c0_2 = arith.constant 0 : index
    %c0_3 = arith.constant 0 : index
    %c0_4 = arith.constant 0 : index
    %9 = vector.load %arg5[%c0_2, %c0_3, %c0_4] : memref<2x32x256xi8, #tpu.memory_space<vmem>>, vector<2x32x256xi8>
    tpu.vector_store %arg5[%c0_2, %c0_3, %c0_4], %8 {strides = array<i32>} : memref<2x32x256xi8, #tpu.memory_space<vmem>>, vector<2x32x256xi8>,
    %cst = arith.constant dense<true> : vector<2x32x256xi1>
    %10 = arith.xori %7, %cst : vector<2x32x256xi1>
    %c0_5 = arith.constant 0 : index
    %c0_6 = arith.constant 0 : index
    %c0_7 = arith.constant 0 : index
    %11 = vector.load %arg3[%c0_5, %c0_6, %c0_7] : memref<2x32x256xf32, #tpu.memory_space<vmem>>, vector<2x32x256xf32>
    %c0_i32 = arith.constant 0 : i32
    %12 = arith.sitofp %c0_i32 : i32 to f32
    %13 = vector.broadcast %12 : f32 to vector<2x32x256xf32>
    %14 = arith.select %10, %11, %13 : vector<2x32x256xi1>, vector<2x32x256xf32>
    %c0_8 = arith.constant 0 : index
    %c0_9 = arith.constant 0 : index
    %c0_10 = arith.constant 0 : index
    %15 = vector.load %arg4[%c0_8, %c0_9, %c0_10] : memref<2x32x256xf32, #tpu.memory_space<vmem>>, vector<2x32x256xf32>
    tpu.vector_store %arg4[%c0_8, %c0_9, %c0_10], %14 {strides = array<i32>} : memref<2x32x256xf32, #tpu.memory_space<vmem>>, vector<2x32x256xf32>,
    return
  }
  func.func @transform_0(%arg0: i32, %arg1: i32) -> (i32, i32, i32) {
    %c0_i32 = arith.constant 0 : i32
    %c0_i32_0 = arith.constant 0 : i32
    return %arg0, %c0_i32, %arg1 : i32, i32, i32
  }
  func.func @transform_1(%arg0: i32, %arg1: i32) -> (i32, i32, i32) {
    %c0_i32 = arith.constant 0 : i32
    %c0_i32_0 = arith.constant 0 : i32
    return %arg0, %c0_i32, %arg1 : i32, i32, i32
  }
  func.func @transform_2(%arg0: i32, %arg1: i32) -> (i32, i32, i32) {
    %c0_i32 = arith.constant 0 : i32
    %c0_i32_0 = arith.constant 0 : i32
    return %arg0, %c0_i32, %arg1 : i32, i32, i32
  }
  func.func @transform_3(%arg0: i32, %arg1: i32) -> (i32, i32, i32) {
    %c0_i32 = arith.constant 0 : i32
    %c0_i32_0 = arith.constant 0 : i32
    return %arg0, %c0_i32, %arg1 : i32, i32, i32
  }
}

</mosaic_0001>

<bundles_post_ra>
// kernel: tpu_custom_call.1
= control target key start
LH: loop header
LB: loop body
LE: loop exit
PB: predicated region body
PF: predicated region fallthrough
CT: control target
= control target key end

     0   :  { %9 = vsyncpa [#allocation3], 0  ;;  %s520_s0 = inlined_call_operand.hbm [shape: s32[2,1,256], index: 0, kind: input, shape index: {}]   ;;  %s521_s1 = inlined_call_operand.hbm [shape: f32[2,32,256], index: 1, kind: input, shape index: {}]   ;;  %s522_s2 = inlined_call_operand.hbm [shape: f32[2,32,256], index: 2, kind: output, shape index: {0}]   ;;  %s523_s3 = inlined_call_operand.hbm [shape: s8[2,32,256], index: 3, kind: output, shape index: {1}]  }
   0x1   :  { %10 = vsyncpa [#allocation6], 0 }
   0x2   :  { %11 = vsyncpa [#allocation4], 0 }
   0x3   :  { %12 = vsyncpa [#allocation9], 0  ;;  %s304_s12 = smov [#allocation2]  }
   0x4   :  { %s18_s13 = sshll.u32 %s304_s12, 4  ;;  %s19_s13 = int_to_ptr.vmem [resolvable:$true] %s18_s13 }
   0x5   :  { %s224_s14 = scalar_lea.vmem %s19_s13, 64  ;;  %p229_p1 = scmp.lt.s32.totalorder %s19_s13, %s19_s13 }
   0x6   :  { %p225_p0 = scmp.ne.s32.totalorder %s19_s13, %s224_s14  ;;  %p230_p2 = scmp.lt.s32.totalorder %s224_s14, %s224_s14 }
   0x8   :  { %p231_p3 = por %p230_p2, %p229_p1 }
   0xa   :  { %p232_p4 = pnand %p231_p3, %p225_p0 }
   0xc   :  { %235 = shalt.err (!%p232_p4)
}
   0xd   :  { %s305_s15 = smov 32   ;;  %s306_s16 = smov 2  }
   0xe   :  { %24 = dma.hbm_to_vmem [thread:$0]  %s520_s0, 64, %s19_s13, [#allocation3], %s305_s15, %s305_s15, %s306_s16  }
   0xf   :  { %s307_s19 = smov [#allocation5]  }
  0x10   :  { %s30_s20 = sshll.u32 %s307_s19, 4  ;;  %s31_s20 = int_to_ptr.vmem [resolvable:$true] %s30_s20 }
  0x11   :  { %s244_s21 = scalar_lea.vmem %s31_s20, 2048  ;;  %p249_p6 = scmp.lt.s32.totalorder %s31_s20, %s31_s20 }
  0x12   :  { %p245_p5 = scmp.ne.s32.totalorder %s31_s20, %s244_s21  ;;  %p250_p7 = scmp.lt.s32.totalorder %s244_s21, %s244_s21 }
  0x14   :  { %p251_p8 = por %p250_p7, %p249_p6 }
  0x16   :  { %p252_p9 = pnand %p251_p8, %p245_p5 }
  0x18   :  { %255 = shalt.err (!%p252_p9)
}
  0x19   :  { %s308_s22 = smov 256   ;;  %s309_s23 = smov 16  }
  0x1a   :  { %36 = dma.hbm_to_vmem [thread:$0]  %s521_s1, 2048, %s31_s20, [#allocation6], %s308_s22, %s308_s22, %s309_s23  }
  0x1b   :  { %296 = dma.done.wait [#allocation3], 64  }
  0x1c   :  { %297 = vsyncadd [#allocation3], 4294967232 }
  0x1d   :  { %298 = dma.done.wait [#allocation6], 2048  }
  0x1e   :  { %299 = vsyncadd [#allocation6], 4294965248  ;;  %v51_v0 = vlaneseq  ;;  %v45_v2 = vld [vmem:[#allocation2] sm:$0x3]  ;;  %v46_v3 = vld [vmem:[#allocation2 + $0x2] sm:$0x3] }
  0x1f   :  { %v47_v4 = vadd.s32 1, %v45_v2  ;;  %v48_v7 = vadd.s32 1, %v46_v3  ;;  %v310_v17 = vmov 0   ;;  %s311_s0 = smov [#allocation8]   ;;  %v124_v21 = vld [vmem:[#allocation5] sm:$0xff]  ;;  %v125_v22 = vld [vmem:[#allocation5 + $0x8] sm:$0xff] }
  0x20   :  { %v343_v1 = vshrl.u32 %v51_v0, 7  ;;  %s189_s1 = sshll.u32 %s311_s0, 4  ;;  %v126_v24 = vld [vmem:[#allocation5 + $0x10] sm:$0xff]  ;;  %v127_v26 = vld [vmem:[#allocation5 + $0x18] sm:$0xff]  ;;  %v128_v28 = vld [vmem:[#allocation5 + $0x20] sm:$0xff]  ;;  %s190_s1 = int_to_ptr.vmem [resolvable:$true] %s189_s1 }
  0x21   :  { %v49_v9 = vmul.u32 4, %v47_v4  ;;  %v50_v12 = vmul.u32 4, %v48_v7  ;;  %s256_s26 = scalar_lea.vmem %s190_s1, 512  ;;  %p261_p11 = scmp.lt.s32.totalorder %s190_s1, %s190_s1 }
  0x22   :  { %v58_v5 = vsub.s32 0, %v343_v1  ;;  %v62_v6 = vsub.s32 1, %v343_v1  ;;  %v348_v8 = vadd.s32 8, %v343_v1  ;;  %v351_v10 = vadd.s32 16, %v343_v1  ;;  %p257_p10 = scmp.ne.s32.totalorder %s190_s1, %s256_s26  ;;  %p262_p12 = scmp.lt.s32.totalorder %s256_s26, %s256_s26 }
  0x23   :  { %v354_v11 = vadd.s32 24, %v343_v1 }
  0x24   :  { %v356_v13 = vrot.slane %v49_v9, %v58_v5  ;;  %v358_v14 = vrot.slane %v49_v9, %v62_v6  ;;  %v360_v15 = vrot.slane %v50_v12, %v58_v5  ;;  %v390_v16 = vrot.slane %v50_v12, %v62_v6  ;;  %p263_p13 = por %p262_p12, %p261_p11 }
  0x26   :  { %vm72_vm0 = vcmp.ge.s32.totalorder %v343_v1, %v356_v13  ;;  %vm74_vm1 = vcmp.ge.s32.totalorder %v348_v8, %v356_v13  ;;  %vm76_vm2 = vcmp.ge.s32.totalorder %v351_v10, %v356_v13  ;;  %vm524_vm3 = vcmp.ge.s32.totalorder %v354_v11, %v356_v13  ;;  %p264_p0 = pnand %p263_p13, %p257_p10 }
  0x27   :  { %vm88_vm4 = vmpackc.low %vm74_vm1, %vm72_vm0  ;;  %vm73_vm5 = vcmp.ge.s32.totalorder %v343_v1, %v358_v14  ;;  %vm75_vm6 = vcmp.ge.s32.totalorder %v348_v8, %v358_v14  ;;  %vm77_vm8 = vcmp.ge.s32.totalorder %v351_v10, %v358_v14  ;;  %vm525_vm9 = vcmp.ge.s32.totalorder %v354_v11, %v358_v14 }
  0x28   :  { %vm89_vm7 = vmpackc.low %vm524_vm3, %vm76_vm2  ;;  %vm527_vm12 = vcmp.ge.s32.totalorder %v343_v1, %v360_v15  ;;  %vm526_vm13 = vcmp.ge.s32.totalorder %v348_v8, %v360_v15  ;;  %vm529_vm15 = vcmp.ge.s32.totalorder %v351_v10, %v360_v15  ;;  %vm81_vm3 = vcmp.ge.s32.totalorder %v343_v1, %v390_v16 }
  0x29   :  { %vm90_vm10 = vmpackc.even %vm89_vm7, %vm88_vm4  ;;  %vm528_vm4 = vcmp.ge.s32.totalorder %v354_v11, %v360_v15 }
  0x2a   :  { %v100_v18 = vsel %vm90_vm10, 16843009, %v310_v17  ;;  %vm91_vm11 = vmpackc.low %vm75_vm6, %vm73_vm5 }
  0x2b   :  { %104 = vst [vmem:[#allocation8] sm:$0xff] %v100_v18  ;;  %vm92_vm14 = vmpackc.low %vm525_vm9, %vm77_vm8  ;;  %vm83_vm9 = vcmp.ge.s32.totalorder %v348_v8, %v390_v16 }
  0x2c   :  { %vm93_vm7 = vmpackc.even %vm92_vm14, %vm91_vm11  ;;  %vm85_vm14 = vcmp.ge.s32.totalorder %v351_v10, %v390_v16 }
  0x2d   :  { %v101_v19 = vsel %vm93_vm7, 16843009, %v310_v17  ;;  %vm94_vm10 = vmpackc.low %vm526_vm13, %vm527_vm12  ;;  %vm87_vm7 = vcmp.ge.s32.totalorder %v354_v11, %v390_v16 }
  0x2e   :  { %105 = vst [vmem:[#allocation8 + $0x8] sm:$0xff] %v101_v19  ;;  %vm95_vm11 = vmpackc.low %vm528_vm4, %vm529_vm15 }
  0x2f   :  { %vm96_vm13 = vmpackc.even %vm95_vm11, %vm94_vm10 }
  0x30   :  { %v102_v20 = vsel %vm96_vm13, 16843009, %v310_v17  ;;  %vm97_vm12 = vmpackc.low %vm83_vm9, %vm81_vm3  ;;  %vm312_vm13 = vmmov 1  }
  0x31   :  { %106 = vst [vmem:[#allocation8 + $0x10] sm:$0xff] %v102_v20  ;;  %vm98_vm4 = vmpackc.low %vm87_vm7, %vm85_vm14 }
  0x32   :  { %vm99_vm10 = vmpackc.even %vm98_vm4, %vm97_vm12 }
  0x33   :  { %v103_v23 = vsel %vm99_vm10, 16843009, %v310_v17  ;;  %vm108_vm11 = vmxor %vm72_vm0, %vm312_vm13 }
  0x34   :  { %107 = vst [vmem:[#allocation8 + $0x18] sm:$0xff] %v103_v23  ;;  %v140_v25 = vsel %vm108_vm11, %v124_v21, 0.0  ;;  %vm109_vm15 = vmxor %vm73_vm5, %vm312_vm13 }
  0x35   :  { %156 = vst [vmem:[#allocation7] sm:$0xff] %v140_v25  ;;  %v141_v27 = vsel %vm109_vm15, %v125_v22, 0.0  ;;  %vm110_vm12 = vmxor %vm74_vm1, %vm312_vm13 }
  0x36   :  { %267 = shalt.err (!%p264_p0)
}
  0x37   :  { %195 = dma.vmem_to_hbm [thread:$0]  %s190_s1, 512, %s523_s3, [#allocation9], %s308_s22, %s308_s22, %s309_s23   ;;  %157 = vst [vmem:[#allocation7 + $0x8] sm:$0xff] %v141_v27  ;;  %v142_v29 = vsel %vm110_vm12, %v126_v24, 0.0  ;;  %vm111_vm0 = vmxor %vm75_vm6, %vm312_vm13  ;;  %v129_v30 = vld [vmem:[#allocation5 + $0x28] sm:$0xff]  ;;  %v130_v32 = vld [vmem:[#allocation5 + $0x30] sm:$0xff]  ;;  %vm530_vm6 = vcmp.ge.s32.totalorder %v354_v11, %v356_v13  ;;  %vm533_vm12 = vcmp.ge.s32.totalorder %v348_v8, %v360_v15 }
  0x38   :  { %158 = vst [vmem:[#allocation7 + $0x10] sm:$0xff] %v142_v29  ;;  %v143_v31 = vsel %vm111_vm0, %v127_v26, 0.0  ;;  %vm112_vm1 = vmxor %vm76_vm2, %vm312_vm13  ;;  %v131_v34 = vld [vmem:[#allocation5 + $0x38] sm:$0xff]  ;;  %v132_v36 = vld [vmem:[#allocation5 + $0x40] sm:$0xff]  ;;  %vm531_vm2 = vcmp.ge.s32.totalorder %v354_v11, %v358_v14  ;;  %s313_s3 = smov [#allocation7]  }
  0x39   :  { %159 = vst [vmem:[#allocation7 + $0x18] sm:$0xff] %v143_v31  ;;  %v144_v33 = vsel %vm112_vm1, %v128_v28, 0.0  ;;  %vm113_vm5 = vmxor %vm77_vm8, %vm312_vm13  ;;  %v133_v38 = vld [vmem:[#allocation5 + $0x48] sm:$0xff]  ;;  %vm532_vm8 = vcmp.ge.s32.totalorder %v343_v1, %v360_v15  ;;  %v134_v40 = vld [vmem:[#allocation5 + $0x50] sm:$0xff]  ;;  %s177_s29 = sshll.u32 %s313_s3, 4  ;;  %s178_s29 = int_to_ptr.vmem [resolvable:$true] %s177_s29 }
  0x3a   :  { %160 = vst [vmem:[#allocation7 + $0x20] sm:$0xff] %v144_v33  ;;  %v145_v35 = vsel %vm113_vm5, %v129_v30, 0.0  ;;  %vm114_vm15 = vmxor %vm530_vm6, %vm312_vm13  ;;  %v135_v42 = vld [vmem:[#allocation5 + $0x58] sm:$0xff]  ;;  %v136_v44 = vld [vmem:[#allocation5 + $0x60] sm:$0xff]  ;;  %s276_s30 = scalar_lea.vmem %s178_s29, 2048  ;;  %p281_p2 = scmp.lt.s32.totalorder %s178_s29, %s178_s29 }
  0x3b   :  { %161 = vst [vmem:[#allocation7 + $0x28] sm:$0xff] %v145_v35  ;;  %v146_v37 = vsel %vm114_vm15, %v130_v32, 0.0  ;;  %vm115_vm4 = vmxor %vm531_vm2, %vm312_vm13  ;;  %v137_v46 = vld [vmem:[#allocation5 + $0x68] sm:$0xff]  ;;  %v138_v48 = vld [vmem:[#allocation5 + $0x70] sm:$0xff]  ;;  %p277_p1 = scmp.ne.s32.totalorder %s178_s29, %s276_s30  ;;  %p282_p3 = scmp.lt.s32.totalorder %s276_s30, %s276_s30 }
  0x3c   :  { %162 = vst [vmem:[#allocation7 + $0x30] sm:$0xff] %v146_v37  ;;  %v147_v39 = vsel %vm115_vm4, %v131_v34, 0.0  ;;  %vm116_vm10 = vmxor %vm532_vm8, %vm312_vm13  ;;  %v139_v50 = vld [vmem:[#allocation5 + $0x78] sm:$0xff] }
  0x3d   :  { %163 = vst [vmem:[#allocation7 + $0x38] sm:$0xff] %v147_v39  ;;  %v148_v41 = vsel %vm116_vm10, %v132_v36, 0.0  ;;  %vm117_vm11 = vmxor %vm81_vm3, %vm312_vm13  ;;  %vm534_vm3 = vcmp.ge.s32.totalorder %v351_v10, %v360_v15  ;;  %p283_p4 = por %p282_p3, %p281_p2 }
  0x3e   :  { %164 = vst [vmem:[#allocation7 + $0x40] sm:$0xff] %v148_v41  ;;  %v149_v43 = vsel %vm117_vm11, %v133_v38, 0.0  ;;  %vm118_vm0 = vmxor %vm533_vm12, %vm312_vm13 }
  0x3f   :  { %165 = vst [vmem:[#allocation7 + $0x48] sm:$0xff] %v149_v43  ;;  %v150_v45 = vsel %vm118_vm0, %v134_v40, 0.0  ;;  %vm119_vm1 = vmxor %vm83_vm9, %vm312_vm13  ;;  %vm535_vm9 = vcmp.ge.s32.totalorder %v354_v11, %v360_v15  ;;  %p284_p5 = pnand %p283_p4, %p277_p1 }
  0x40   :  { %166 = vst [vmem:[#allocation7 + $0x50] sm:$0xff] %v150_v45  ;;  %v151_v47 = vsel %vm119_vm1, %v135_v42, 0.0  ;;  %vm120_vm5 = vmxor %vm534_vm3, %vm312_vm13 }
  0x41   :  { %167 = vst [vmem:[#allocation7 + $0x58] sm:$0xff] %v151_v47  ;;  %v152_v49 = vsel %vm120_vm5, %v136_v44, 0.0  ;;  %vm121_vm6 = vmxor %vm85_vm14, %vm312_vm13 }
  0x42   :  { %168 = vst [vmem:[#allocation7 + $0x60] sm:$0xff] %v152_v49  ;;  %v153_v51 = vsel %vm121_vm6, %v137_v46, 0.0  ;;  %vm122_vm15 = vmxor %vm535_vm9, %vm312_vm13 }
  0x43   :  { %169 = vst [vmem:[#allocation7 + $0x68] sm:$0xff] %v153_v51  ;;  %v154_v52 = vsel %vm122_vm15, %v138_v48, 0.0  ;;  %vm123_vm2 = vmxor %vm87_vm7, %vm312_vm13 }
  0x44   :  { %170 = vst [vmem:[#allocation7 + $0x70] sm:$0xff] %v154_v52  ;;  %v155_v53 = vsel %vm123_vm2, %v139_v50, 0.0 }
  0x45   :  { %171 = vst [vmem:[#allocation7 + $0x78] sm:$0xff] %v155_v53 }
  0x46   :  { %287 = shalt.err (!%p284_p5)
}
  0x47   :  { %183 = dma.vmem_to_hbm [thread:$0]  %s178_s29, 2048, %s522_s2, [#allocation4], %s308_s22, %s308_s22, %s309_s23  }
  0x48   :  { %300 = dma.done.wait [#allocation4], 2048  }
  0x49   :  { %301 = vsyncadd [#allocation4], 4294965248 }
  0x4a   :  { %302 = dma.done.wait [#allocation9], 512  }
  0x4b   :  { %303 = vsyncadd [#allocation9], 4294966784 }
  0x4c   :  { %202 = vsyncpa [#allocation3], 1 }
  0x4d   :  { %203 = vsyncpa [#allocation6], 1 }
  0x4e   :  { %204 = vsyncpa [#allocation4], 1 }
  0x4f   :  { %205 = vsyncpa [#allocation9], 1 }

</bundles_post_ra>
